<compile_context>
chip_gen: v7x
topology: tpu7x:2x2x1
jax: 0.10.0
libtpu: 0.0.40
codegen_flags: <defaults>
</compile_context>

<pallas_src>
import jax
import jax.numpy as jnp
import numpy as np
from jax.experimental import pallas as pl
from jax.experimental.pallas import tpu as pltpu


EPS = 1e-12
_ROW_QUANTUM = 16   # bf16 sublane pack; also bounds row-padding waste to <= 15 rows


def _round_up(a, b):
    return ((a + b - 1) // b) * b


def _cdiv(a, b):
    return -(-a // b)


def _preprocess_params(params, splits):
    """Split w0 into per-metric (W_x', W_logx, W_log1mx) row blocks; fold the (1-x)
    linear segment into W_x'/b0' in f32 (exact algebra), then cast weights to bf16.

    Original (PyTorch) row order of w0, per metric j of width f_j:
        [m_j, 1-m_j, log(m_j+eps), log(1-m_j+eps)]   (interleaved per metric)
    """
    w0 = jnp.asarray(params["w0"], jnp.float32)
    b0 = jnp.asarray(params["b0"], jnp.float32)
    wx, wlx, wlix = [], [], []
    b0p = b0
    off = 0
    for f_j in splits:
        W_x = w0[off:off + f_j]
        W_ix = w0[off + f_j:off + 2 * f_j]
        W_lx = w0[off + 2 * f_j:off + 3 * f_j]
        W_lix = w0[off + 3 * f_j:off + 4 * f_j]
        # (1-x) @ W_ix = colsum(W_ix) - x @ W_ix   (folded in f32, before bf16 cast)
        b0p = b0p + jnp.sum(W_ix, axis=0)
        wx.append((W_x - W_ix).astype(jnp.bfloat16))
        wlx.append(W_lx.astype(jnp.bfloat16))
        wlix.append(W_lix.astype(jnp.bfloat16))
        off += 4 * f_j

    return {
        "wx": wx, "wlx": wlx, "wlix": wlix,
        "b0": b0p.reshape(1, -1),
        "w1": jnp.asarray(params["w1"], jnp.float32).astype(jnp.bfloat16),
        "b1": jnp.asarray(params["b1"], jnp.float32).reshape(1, -1),
        "w2": jnp.asarray(params["w2"], jnp.float32).astype(jnp.bfloat16),
        "b2": jnp.asarray(params["b2"], jnp.float32).reshape(1, -1),
        "wm": jnp.asarray(params["wm"], jnp.float32).astype(jnp.bfloat16),
        "bm": jnp.asarray(params["bm"], jnp.float32).reshape(1, -1),
    }


def _make_mlp_kernel(num_metrics):
    def kernel(*refs):
        i = 0
        m_refs = refs[i:i + num_metrics]; i += num_metrics
        w0_refs = refs[i:i + 3 * num_metrics]; i += 3 * num_metrics
        (b0_ref, w1_ref, b1_ref, w2_ref, b2_ref, wm_ref, bm_ref, o_ref) = refs[i:]

        # ---- first layer: per-metric dots, no lane-axis concatenation ----
        acc = None
        for j in range(num_metrics):
            x = m_refs[j][...]                     # f32 (tile, f_j), VPU
            lx = jnp.log(x + EPS)                  # f32, EUP
            lix = jnp.log((1.0 - x) + EPS)         # f32, VPU + EUP
            wx_ref, wlx_ref, wlix_ref = w0_refs[3 * j:3 * j + 3]
            d = jnp.dot(x.astype(jnp.bfloat16), wx_ref[...],
                        preferred_element_type=jnp.float32)
            d = d + jnp.dot(lx.astype(jnp.bfloat16), wlx_ref[...],
                            preferred_element_type=jnp.float32)
            d = d + jnp.dot(lix.astype(jnp.bfloat16), wlix_ref[...],
                            preferred_element_type=jnp.float32)
            acc = d if acc is None else acc + d

        # ---- hidden layers + mapping: bf16 MXU operands, f32 accum/bias/ReLU ----
        h = jnp.maximum(acc + b0_ref[...], 0.0)
        h = jnp.maximum(
            jnp.dot(h.astype(jnp.bfloat16), w1_ref[...],
                    preferred_element_type=jnp.float32) + b1_ref[...], 0.0)
        h = jnp.maximum(
            jnp.dot(h.astype(jnp.bfloat16), w2_ref[...],
                    preferred_element_type=jnp.float32) + b2_ref[...], 0.0)
        o_ref[...] = jnp.dot(h.astype(jnp.bfloat16), wm_ref[...],
                             preferred_element_type=jnp.float32) + bm_ref[...]

    return kernel


def numerical_mlp_forward(inputs, params, tile_rows=1024):
    """inputs: list of metric arrays, each (..., f_i); returns (..., out_features)."""
    splits = tuple(int(m.shape[-1]) for m in inputs)
    lead = inputs[0].shape[:-1]
    n_rows = int(np.prod(lead)) if lead else 1

    mats = [m.reshape(n_rows, s).astype(jnp.float32) for m, s in zip(inputs, splits)]

    # Rows padded only to a small quantum (never to a full tile); pad with a benign
    # value so log() on padded rows stays finite.
    n_pad = _round_up(max(n_rows, 1), _ROW_QUANTUM)
    if n_pad != n_rows:
        mats = [jnp.pad(m, ((0, n_pad - n_rows), (0, 0)), constant_values=0.5)
                for m in mats]

    # Row tile: large (1024 by default), multiple of 16; capped at ~half the rows so
    # the "parallel" grid keeps >= 2 steps for v7x's two TensorCores.
    half = _round_up(_cdiv(n_pad, 2), _ROW_QUANTUM)
    tile = min(_round_up(int(tile_rows), _ROW_QUANTUM), max(half, _ROW_QUANTUM))
    grid = _cdiv(n_pad, tile)   # last block may overhang; its writeback is masked

    prep = _preprocess_params(params, splits)
    out_features = int(prep["wm"].shape[1])

    w0_ops = []
    for j in range(len(splits)):
        w0_ops += [prep["wx"][j], prep["wlx"][j], prep["wlix"][j]]
    tail_ops = [prep["b0"], prep["w1"], prep["b1"], prep["w2"], prep["b2"],
                prep["wm"], prep["bm"]]
    operands = mats + w0_ops + tail_ops

    # Streamed (row-tiled) specs for the metrics; resident single-block specs for
    # the small weights/biases.
    metric_specs = [pl.BlockSpec((tile, s), lambda i: (i, 0)) for s in splits]

    def resident(a):
        return pl.BlockSpec(a.shape, lambda i: (0,) * a.ndim)

    weight_specs = [resident(a) for a in w0_ops + tail_ops]

    out = pl.pallas_call(
        _make_mlp_kernel(len(splits)),
        out_shape=jax.ShapeDtypeStruct((n_pad, out_features), jnp.float32),
        grid=(grid,),
        in_specs=metric_specs + weight_specs,
        out_specs=pl.BlockSpec((tile, out_features), lambda i: (i, 0)),
        compiler_params=pltpu.CompilerParams(
            dimension_semantics=("parallel",),
            vmem_limit_bytes=32 * 1024 * 1024,
        ),
    )(*operands)

    return out[:n_rows, :].reshape(*lead, out_features)


# ----------------------------- references -----------------------------------

def reference_forward_f32(inputs, params):
    """Pure-f32 JAX reference mirroring the PyTorch module exactly (eval mode)."""
    feats = []
    for m in inputs:
        m = m.astype(jnp.float32)
        im = 1.0 - m
        feats.extend([m, im, jnp.log(m + EPS), jnp.log(im + EPS)])
    f = jnp.concatenate(feats, axis=-1)
    h = jax.nn.relu(f @ params["w0"] + params["b0"])
    h = jax.nn.relu(h @ params["w1"] + params["b1"])
    h = jax.nn.relu(h @ params["w2"] + params["b2"])
    return h @ params["wm"] + params["bm"]


def reference_forward_bf16(inputs, params):
    """Reference mirroring the kernel's numerics exactly: f32-folded weights, bf16
    MXU operands, f32 accumulation, per-metric first-layer dots."""
    splits = tuple(int(m.shape[-1]) for m in inputs)
    prep = _preprocess_params(params, splits)

    def lin(x, w, b):
        return jnp.dot(x.astype(jnp.bfloat16), w,
                       preferred_element_type=jnp.float32) + b

    acc = None
    for j, m in enumerate(inputs):
        x = m.astype(jnp.float32)
        lx = jnp.log(x + EPS)
        lix = jnp.log((1.0 - x) + EPS)
        d = (jnp.dot(x.astype(jnp.bfloat16), prep["wx"][j],
                     preferred_element_type=jnp.float32)
             + jnp.dot(lx.astype(jnp.bfloat16), prep["wlx"][j],
                       preferred_element_type=jnp.float32)
             + jnp.dot(lix.astype(jnp.bfloat16), prep["wlix"][j],
                       preferred_element_type=jnp.float32))
        acc = d if acc is None else acc + d
    h = jax.nn.relu(acc + prep["b0"])
    h = jax.nn.relu(lin(h, prep["w1"], prep["b1"]))
    h = jax.nn.relu(lin(h, prep["w2"], prep["b2"]))
    return lin(h, prep["wm"], prep["bm"])


def init_params(key, in_features, hidden, out_features):
    ks = jax.random.split(key, 8)

    def lin(kw, kb, fan_in, fan_out):
        bound = 1.0 / np.sqrt(fan_in)
        w = jax.random.uniform(kw, (fan_in, fan_out), jnp.float32, -bound, bound)
        b = jax.random.uniform(kb, (fan_out,), jnp.float32, -bound, bound)
        return w, b

    w0, b0 = lin(ks[0], ks[1], in_features * 4, hidden)
    w1, b1 = lin(ks[2], ks[3], hidden, hidden)
    w2, b2 = lin(ks[4], ks[5], hidden, hidden)
    wm, bm = lin(ks[6], ks[7], hidden, out_features)
    return {"w0": w0, "b0": b0, "w1": w1, "b1": b1,
            "w2": w2, "b2": b2, "wm": wm, "bm": bm}


if __name__ == "__main__":
    key = jax.random.PRNGKey(0)
    k_in1, k_in2, k_params = jax.random.split(key, 3)

    batch, seq = 2, 8
    f1, f2 = 8, 8                   # two uncertainty metrics
    in_features = f1 + f2
    hidden, out_features = 32, 4

    # metrics are probabilities in (0, 1)
    m1 = jax.random.uniform(k_in1, (batch, seq, f1), jnp.float32, 0.02, 0.98)
    m2 = jax.random.uniform(k_in2, (batch, seq, f2), jnp.float32, 0.02, 0.98)

    params = init_params(k_params, in_features, hidden, out_features)

    out = numerical_mlp_forward([m1, m2], params)
    out = jax.block_until_ready(out)
    out_np = np.asarray(out)

    # Tight check vs a reference mirroring the kernel's bf16-MXU numerics.
    ref_bf16 = np.asarray(jax.block_until_ready(reference_forward_bf16([m1, m2], params)))
    np.testing.assert_allclose(out_np, ref_bf16, rtol=2e-3, atol=5e-4)

    # Looser check vs the pure-f32 PyTorch-equivalent reference.
    ref_f32 = np.asarray(jax.block_until_ready(reference_forward_f32([m1, m2], params)))
    np.testing.assert_allclose(out_np, ref_f32, rtol=5e-2, atol=5e-2)

    print("KERNEL_OK")
</pallas_src>

<mosaic_0001>
module attributes {stable_mosaic.version = 11 : i64} {
  func.func @kernel(%arg0: i32, %arg1: memref<16x8xf32, #tpu.memory_space<vmem>>, %arg2: memref<16x8xf32, #tpu.memory_space<vmem>>, %arg3: memref<8x32xbf16, #tpu.memory_space<vmem>>, %arg4: memref<8x32xbf16, #tpu.memory_space<vmem>>, %arg5: memref<8x32xbf16, #tpu.memory_space<vmem>>, %arg6: memref<8x32xbf16, #tpu.memory_space<vmem>>, %arg7: memref<8x32xbf16, #tpu.memory_space<vmem>>, %arg8: memref<8x32xbf16, #tpu.memory_space<vmem>>, %arg9: memref<1x32xf32, #tpu.memory_space<vmem>>, %arg10: memref<32x32xbf16, #tpu.memory_space<vmem>>, %arg11: memref<1x32xf32, #tpu.memory_space<vmem>>, %arg12: memref<32x32xbf16, #tpu.memory_space<vmem>>, %arg13: memref<1x32xf32, #tpu.memory_space<vmem>>, %arg14: memref<32x4xbf16, #tpu.memory_space<vmem>>, %arg15: memref<1x4xf32, #tpu.memory_space<vmem>>, %arg16: memref<16x4xf32, #tpu.memory_space<vmem>>) attributes {dimension_semantics = [#tpu.dimension_semantics<parallel>], iteration_bounds = array<i64: 1>, scalar_prefetch = 0 : i64, scratch_operands = 0 : i64, tpu.core_type = #tpu.core_type<tc>, window_params = [{transform_indices = @transform_0, window_bounds = array<i64: 16, 8>}, {transform_indices = @transform_1, window_bounds = array<i64: 16, 8>}, {pipeline_mode = #tpu.pipeline_mode<synchronous>, transform_indices = @transform_2, window_bounds = array<i64: 8, 32>}, {pipeline_mode = #tpu.pipeline_mode<synchronous>, transform_indices = @transform_3, window_bounds = array<i64: 8, 32>}, {pipeline_mode = #tpu.pipeline_mode<synchronous>, transform_indices = @transform_4, window_bounds = array<i64: 8, 32>}, {pipeline_mode = #tpu.pipeline_mode<synchronous>, transform_indices = @transform_5, window_bounds = array<i64: 8, 32>}, {pipeline_mode = #tpu.pipeline_mode<synchronous>, transform_indices = @transform_6, window_bounds = array<i64: 8, 32>}, {pipeline_mode = #tpu.pipeline_mode<synchronous>, transform_indices = @transform_7, window_bounds = array<i64: 8, 32>}, {pipeline_mode = #tpu.pipeline_mode<synchronous>, transform_indices = @transform_8, window_bounds = array<i64: 1, 32>}, {pipeline_mode = #tpu.pipeline_mode<synchronous>, transform_indices = @transform_9, window_bounds = array<i64: 32, 32>}, {pipeline_mode = #tpu.pipeline_mode<synchronous>, transform_indices = @transform_10, window_bounds = array<i64: 1, 32>}, {pipeline_mode = #tpu.pipeline_mode<synchronous>, transform_indices = @transform_11, window_bounds = array<i64: 32, 32>}, {pipeline_mode = #tpu.pipeline_mode<synchronous>, transform_indices = @transform_12, window_bounds = array<i64: 1, 32>}, {pipeline_mode = #tpu.pipeline_mode<synchronous>, transform_indices = @transform_13, window_bounds = array<i64: 32, 4>}, {pipeline_mode = #tpu.pipeline_mode<synchronous>, transform_indices = @transform_14, window_bounds = array<i64: 1, 4>}, {transform_indices = @transform_15, window_bounds = array<i64: 16, 4>}]} {
    %c0 = arith.constant 0 : index
    %c0_0 = arith.constant 0 : index
    %0 = vector.load %arg1[%c0, %c0_0] : memref<16x8xf32, #tpu.memory_space<vmem>>, vector<16x8xf32>
    %cst = arith.constant 9.99999996E-13 : f32
    %1 = vector.broadcast %cst : f32 to vector<16x8xf32>
    %2 = arith.addf %0, %1 : vector<16x8xf32>
    %3 = math.log %2 : vector<16x8xf32>
    %cst_1 = arith.constant 1.000000e+00 : f32
    %4 = vector.broadcast %cst_1 : f32 to vector<16x8xf32>
    %5 = arith.subf %4, %0 : vector<16x8xf32>
    %cst_2 = arith.constant 9.99999996E-13 : f32
    %6 = vector.broadcast %cst_2 : f32 to vector<16x8xf32>
    %7 = arith.addf %5, %6 : vector<16x8xf32>
    %8 = math.log %7 : vector<16x8xf32>
    %9 = arith.truncf %0 : vector<16x8xf32> to vector<16x8xbf16>
    %c0_3 = arith.constant 0 : index
    %c0_4 = arith.constant 0 : index
    %10 = vector.load %arg3[%c0_3, %c0_4] : memref<8x32xbf16, #tpu.memory_space<vmem>>, vector<8x32xbf16>
    %cst_5 = arith.constant dense<0.000000e+00> : vector<16x32xf32>
    %11 = tpu.matmul %9, %10, %cst_5 {dimension_numbers = #tpu.dot_dimension_numbers<[1], [0], [0], [1], [0, 0, 1, 1], [], []>} : vector<16x8xbf16>, vector<8x32xbf16>, vector<16x32xf32> -> vector<16x32xf32>
    %12 = arith.truncf %3 : vector<16x8xf32> to vector<16x8xbf16>
    %c0_6 = arith.constant 0 : index
    %c0_7 = arith.constant 0 : index
    %13 = vector.load %arg4[%c0_6, %c0_7] : memref<8x32xbf16, #tpu.memory_space<vmem>>, vector<8x32xbf16>
    %cst_8 = arith.constant dense<0.000000e+00> : vector<16x32xf32>
    %14 = tpu.matmul %12, %13, %cst_8 {dimension_numbers = #tpu.dot_dimension_numbers<[1], [0], [0], [1], [0, 0, 1, 1], [], []>} : vector<16x8xbf16>, vector<8x32xbf16>, vector<16x32xf32> -> vector<16x32xf32>
    %15 = arith.addf %11, %14 : vector<16x32xf32>
    %16 = arith.truncf %8 : vector<16x8xf32> to vector<16x8xbf16>
    %c0_9 = arith.constant 0 : index
    %c0_10 = arith.constant 0 : index
    %17 = vector.load %arg5[%c0_9, %c0_10] : memref<8x32xbf16, #tpu.memory_space<vmem>>, vector<8x32xbf16>
    %cst_11 = arith.constant dense<0.000000e+00> : vector<16x32xf32>
    %18 = tpu.matmul %16, %17, %cst_11 {dimension_numbers = #tpu.dot_dimension_numbers<[1], [0], [0], [1], [0, 0, 1, 1], [], []>} : vector<16x8xbf16>, vector<8x32xbf16>, vector<16x32xf32> -> vector<16x32xf32>
    %19 = arith.addf %15, %18 : vector<16x32xf32>
    %c0_12 = arith.constant 0 : index
    %c0_13 = arith.constant 0 : index
    %20 = vector.load %arg2[%c0_12, %c0_13] : memref<16x8xf32, #tpu.memory_space<vmem>>, vector<16x8xf32>
    %cst_14 = arith.constant 9.99999996E-13 : f32
    %21 = vector.broadcast %cst_14 : f32 to vector<16x8xf32>
    %22 = arith.addf %20, %21 : vector<16x8xf32>
    %23 = math.log %22 : vector<16x8xf32>
    %cst_15 = arith.constant 1.000000e+00 : f32
    %24 = vector.broadcast %cst_15 : f32 to vector<16x8xf32>
    %25 = arith.subf %24, %20 : vector<16x8xf32>
    %cst_16 = arith.constant 9.99999996E-13 : f32
    %26 = vector.broadcast %cst_16 : f32 to vector<16x8xf32>
    %27 = arith.addf %25, %26 : vector<16x8xf32>
    %28 = math.log %27 : vector<16x8xf32>
    %29 = arith.truncf %20 : vector<16x8xf32> to vector<16x8xbf16>
    %c0_17 = arith.constant 0 : index
    %c0_18 = arith.constant 0 : index
    %30 = vector.load %arg6[%c0_17, %c0_18] : memref<8x32xbf16, #tpu.memory_space<vmem>>, vector<8x32xbf16>
    %cst_19 = arith.constant dense<0.000000e+00> : vector<16x32xf32>
    %31 = tpu.matmul %29, %30, %cst_19 {dimension_numbers = #tpu.dot_dimension_numbers<[1], [0], [0], [1], [0, 0, 1, 1], [], []>} : vector<16x8xbf16>, vector<8x32xbf16>, vector<16x32xf32> -> vector<16x32xf32>
    %32 = arith.truncf %23 : vector<16x8xf32> to vector<16x8xbf16>
    %c0_20 = arith.constant 0 : index
    %c0_21 = arith.constant 0 : index
    %33 = vector.load %arg7[%c0_20, %c0_21] : memref<8x32xbf16, #tpu.memory_space<vmem>>, vector<8x32xbf16>
    %cst_22 = arith.constant dense<0.000000e+00> : vector<16x32xf32>
    %34 = tpu.matmul %32, %33, %cst_22 {dimension_numbers = #tpu.dot_dimension_numbers<[1], [0], [0], [1], [0, 0, 1, 1], [], []>} : vector<16x8xbf16>, vector<8x32xbf16>, vector<16x32xf32> -> vector<16x32xf32>
    %35 = arith.addf %31, %34 : vector<16x32xf32>
    %36 = arith.truncf %28 : vector<16x8xf32> to vector<16x8xbf16>
    %c0_23 = arith.constant 0 : index
    %c0_24 = arith.constant 0 : index
    %37 = vector.load %arg8[%c0_23, %c0_24] : memref<8x32xbf16, #tpu.memory_space<vmem>>, vector<8x32xbf16>
    %cst_25 = arith.constant dense<0.000000e+00> : vector<16x32xf32>
    %38 = tpu.matmul %36, %37, %cst_25 {dimension_numbers = #tpu.dot_dimension_numbers<[1], [0], [0], [1], [0, 0, 1, 1], [], []>} : vector<16x8xbf16>, vector<8x32xbf16>, vector<16x32xf32> -> vector<16x32xf32>
    %39 = arith.addf %35, %38 : vector<16x32xf32>
    %40 = arith.addf %19, %39 : vector<16x32xf32>
    %c0_26 = arith.constant 0 : index
    %c0_27 = arith.constant 0 : index
    %41 = vector.load %arg9[%c0_26, %c0_27] : memref<1x32xf32, #tpu.memory_space<vmem>>, vector<1x32xf32>
    %42 = vector.broadcast %41 : vector<1x32xf32> to vector<16x32xf32>
    %43 = arith.addf %40, %42 : vector<16x32xf32>
    %cst_28 = arith.constant 0.000000e+00 : f32
    %44 = vector.broadcast %cst_28 : f32 to vector<16x32xf32>
    %45 = arith.maximumf %43, %44 : vector<16x32xf32>
    %46 = arith.truncf %45 : vector<16x32xf32> to vector<16x32xbf16>
    %c0_29 = arith.constant 0 : index
    %c0_30 = arith.constant 0 : index
    %47 = vector.load %arg10[%c0_29, %c0_30] : memref<32x32xbf16, #tpu.memory_space<vmem>>, vector<32x32xbf16>
    %cst_31 = arith.constant dense<0.000000e+00> : vector<16x32xf32>
    %48 = tpu.matmul %46, %47, %cst_31 {dimension_numbers = #tpu.dot_dimension_numbers<[1], [0], [0], [1], [0, 0, 1, 1], [], []>} : vector<16x32xbf16>, vector<32x32xbf16>, vector<16x32xf32> -> vector<16x32xf32>
    %c0_32 = arith.constant 0 : index
    %c0_33 = arith.constant 0 : index
    %49 = vector.load %arg11[%c0_32, %c0_33] : memref<1x32xf32, #tpu.memory_space<vmem>>, vector<1x32xf32>
    %50 = vector.broadcast %49 : vector<1x32xf32> to vector<16x32xf32>
    %51 = arith.addf %48, %50 : vector<16x32xf32>
    %cst_34 = arith.constant 0.000000e+00 : f32
    %52 = vector.broadcast %cst_34 : f32 to vector<16x32xf32>
    %53 = arith.maximumf %51, %52 : vector<16x32xf32>
    %54 = arith.truncf %53 : vector<16x32xf32> to vector<16x32xbf16>
    %c0_35 = arith.constant 0 : index
    %c0_36 = arith.constant 0 : index
    %55 = vector.load %arg12[%c0_35, %c0_36] : memref<32x32xbf16, #tpu.memory_space<vmem>>, vector<32x32xbf16>
    %cst_37 = arith.constant dense<0.000000e+00> : vector<16x32xf32>
    %56 = tpu.matmul %54, %55, %cst_37 {dimension_numbers = #tpu.dot_dimension_numbers<[1], [0], [0], [1], [0, 0, 1, 1], [], []>} : vector<16x32xbf16>, vector<32x32xbf16>, vector<16x32xf32> -> vector<16x32xf32>
    %c0_38 = arith.constant 0 : index
    %c0_39 = arith.constant 0 : index
    %57 = vector.load %arg13[%c0_38, %c0_39] : memref<1x32xf32, #tpu.memory_space<vmem>>, vector<1x32xf32>
    %58 = vector.broadcast %57 : vector<1x32xf32> to vector<16x32xf32>
    %59 = arith.addf %56, %58 : vector<16x32xf32>
    %cst_40 = arith.constant 0.000000e+00 : f32
    %60 = vector.broadcast %cst_40 : f32 to vector<16x32xf32>
    %61 = arith.maximumf %59, %60 : vector<16x32xf32>
    %62 = arith.truncf %61 : vector<16x32xf32> to vector<16x32xbf16>
    %c0_41 = arith.constant 0 : index
    %c0_42 = arith.constant 0 : index
    %63 = vector.load %arg14[%c0_41, %c0_42] : memref<32x4xbf16, #tpu.memory_space<vmem>>, vector<32x4xbf16>
    %cst_43 = arith.constant dense<0.000000e+00> : vector<16x4xf32>
    %64 = tpu.matmul %62, %63, %cst_43 {dimension_numbers = #tpu.dot_dimension_numbers<[1], [0], [0], [1], [0, 0, 1, 1], [], []>} : vector<16x32xbf16>, vector<32x4xbf16>, vector<16x4xf32> -> vector<16x4xf32>
    %c0_44 = arith.constant 0 : index
    %c0_45 = arith.constant 0 : index
    %65 = vector.load %arg15[%c0_44, %c0_45] : memref<1x4xf32, #tpu.memory_space<vmem>>, vector<1x4xf32>
    %66 = vector.broadcast %65 : vector<1x4xf32> to vector<16x4xf32>
    %67 = arith.addf %64, %66 : vector<16x4xf32>
    %c0_46 = arith.constant 0 : index
    %c0_47 = arith.constant 0 : index
    %68 = vector.load %arg16[%c0_46, %c0_47] : memref<16x4xf32, #tpu.memory_space<vmem>>, vector<16x4xf32>
    tpu.vector_store %arg16[%c0_46, %c0_47], %67 {strides = array<i32>} : memref<16x4xf32, #tpu.memory_space<vmem>>, vector<16x4xf32>,
    return
  }
  func.func @transform_0(%arg0: i32) -> (i32, i32) {
    %c0_i32 = arith.constant 0 : i32
    %c0_i32_0 = arith.constant 0 : i32
    return %arg0, %c0_i32 : i32, i32
  }
  func.func @transform_1(%arg0: i32) -> (i32, i32) {
    %c0_i32 = arith.constant 0 : i32
    %c0_i32_0 = arith.constant 0 : i32
    return %arg0, %c0_i32 : i32, i32
  }
  func.func @transform_2(%arg0: i32) -> (i32, i32) {
    %c0_i32 = arith.constant 0 : i32
    %c0_i32_0 = arith.constant 0 : i32
    %c0_i32_1 = arith.constant 0 : i32
    return %c0_i32, %c0_i32_0 : i32, i32
  }
  func.func @transform_3(%arg0: i32) -> (i32, i32) {
    %c0_i32 = arith.constant 0 : i32
    %c0_i32_0 = arith.constant 0 : i32
    %c0_i32_1 = arith.constant 0 : i32
    return %c0_i32, %c0_i32_0 : i32, i32
  }
  func.func @transform_4(%arg0: i32) -> (i32, i32) {
    %c0_i32 = arith.constant 0 : i32
    %c0_i32_0 = arith.constant 0 : i32
    %c0_i32_1 = arith.constant 0 : i32
    return %c0_i32, %c0_i32_0 : i32, i32
  }
  func.func @transform_5(%arg0: i32) -> (i32, i32) {
    %c0_i32 = arith.constant 0 : i32
    %c0_i32_0 = arith.constant 0 : i32
    %c0_i32_1 = arith.constant 0 : i32
    return %c0_i32, %c0_i32_0 : i32, i32
  }
  func.func @transform_6(%arg0: i32) -> (i32, i32) {
    %c0_i32 = arith.constant 0 : i32
    %c0_i32_0 = arith.constant 0 : i32
    %c0_i32_1 = arith.constant 0 : i32
    return %c0_i32, %c0_i32_0 : i32, i32
  }
  func.func @transform_7(%arg0: i32) -> (i32, i32) {
    %c0_i32 = arith.constant 0 : i32
    %c0_i32_0 = arith.constant 0 : i32
    %c0_i32_1 = arith.constant 0 : i32
    return %c0_i32, %c0_i32_0 : i32, i32
  }
  func.func @transform_8(%arg0: i32) -> (i32, i32) {
    %c0_i32 = arith.constant 0 : i32
    %c0_i32_0 = arith.constant 0 : i32
    %c0_i32_1 = arith.constant 0 : i32
    return %c0_i32, %c0_i32_0 : i32, i32
  }
  func.func @transform_9(%arg0: i32) -> (i32, i32) {
    %c0_i32 = arith.constant 0 : i32
    %c0_i32_0 = arith.constant 0 : i32
    %c0_i32_1 = arith.constant 0 : i32
    return %c0_i32, %c0_i32_0 : i32, i32
  }
  func.func @transform_10(%arg0: i32) -> (i32, i32) {
    %c0_i32 = arith.constant 0 : i32
    %c0_i32_0 = arith.constant 0 : i32
    %c0_i32_1 = arith.constant 0 : i32
    return %c0_i32, %c0_i32_0 : i32, i32
  }
  func.func @transform_11(%arg0: i32) -> (i32, i32) {
    %c0_i32 = arith.constant 0 : i32
    %c0_i32_0 = arith.constant 0 : i32
    %c0_i32_1 = arith.constant 0 : i32
    return %c0_i32, %c0_i32_0 : i32, i32
  }
  func.func @transform_12(%arg0: i32) -> (i32, i32) {
    %c0_i32 = arith.constant 0 : i32
    %c0_i32_0 = arith.constant 0 : i32
    %c0_i32_1 = arith.constant 0 : i32
    return %c0_i32, %c0_i32_0 : i32, i32
  }
  func.func @transform_13(%arg0: i32) -> (i32, i32) {
    %c0_i32 = arith.constant 0 : i32
    %c0_i32_0 = arith.constant 0 : i32
    %c0_i32_1 = arith.constant 0 : i32
    return %c0_i32, %c0_i32_0 : i32, i32
  }
  func.func @transform_14(%arg0: i32) -> (i32, i32) {
    %c0_i32 = arith.constant 0 : i32
    %c0_i32_0 = arith.constant 0 : i32
    %c0_i32_1 = arith.constant 0 : i32
    return %c0_i32, %c0_i32_0 : i32, i32
  }
  func.func @transform_15(%arg0: i32) -> (i32, i32) {
    %c0_i32 = arith.constant 0 : i32
    %c0_i32_0 = arith.constant 0 : i32
    return %arg0, %c0_i32 : i32, i32
  }
}

</mosaic_0001>

<bundles_post_ra>
// kernel: tpu_custom_call.1
= control target key start
LH: loop header
LB: loop body
LE: loop exit
PB: predicated region body
PF: predicated region fallthrough
CT: control target
= control target key end

     0   :  { %vm75_vm0 = vcmask 1043456   ;;  %v736_v0 = vmov 0.0   ;;  %vm737_vm1 = vmmov 0   ;;  %vm71_vm2 = vcmask 64512   ;;  %s939_s3 = inlined_call_operand.vmem [shape: bf16[8,32], index: 3, kind: input, shape index: {}]   ;;  %s940_s2 = inlined_call_operand.vmem [shape: bf16[8,32], index: 2, kind: input, shape index: {}]   ;;  %s941_s0 = inlined_call_operand.vmem [shape: f32[16,8], index: 0, kind: input, shape index: {}]   ;;  %s942_s1 = inlined_call_operand.vmem [shape: f32[16,8], index: 1, kind: input, shape index: {}]   ;;  %s943_s6 = inlined_call_operand.vmem [shape: bf16[8,32], index: 6, kind: input, shape index: {}]   ;;  %s944_s4 = inlined_call_operand.vmem [shape: bf16[8,32], index: 4, kind: input, shape index: {}]   ;;  %s945_s7 = inlined_call_operand.vmem [shape: bf16[8,32], index: 7, kind: input, shape index: {}]   ;;  %s946_s5 = inlined_call_operand.vmem [shape: bf16[8,32], index: 5, kind: input, shape index: {}]   ;;  %s947_s9 = inlined_call_operand.vmem [shape: bf16[32,32], index: 9, kind: input, shape index: {}]   ;;  %s948_s8 = inlined_call_operand.vmem [shape: f32[1,32], index: 8, kind: input, shape index: {}]   ;;  %s949_s11 = inlined_call_operand.vmem [shape: bf16[32,32], index: 11, kind: input, shape index: {}]   ;;  %s950_s10 = inlined_call_operand.vmem [shape: f32[1,32], index: 10, kind: input, shape index: {}]   ;;  %s951_s13 = inlined_call_operand.vmem [shape: bf16[32,4], index: 13, kind: input, shape index: {}]   ;;  %s952_s12 = inlined_call_operand.vmem [shape: f32[1,32], index: 12, kind: input, shape index: {}]   ;;  %s953_s14 = inlined_call_operand.vmem [shape: f32[1,4], index: 14, kind: input, shape index: {}]   ;;  %s954_s15 = inlined_call_operand.vmem [shape: f32[16,4], index: 15, kind: output, shape index: {}]  }
   0x1   :  { %652 = vmatprep.subr.bf16.mxu0 %v736_v0  ;;  %658 = vmatprep.subr.bf16.mxu1 %v736_v0  ;;  %v70_v1 = vld [vmem:[%s939_s3] sm:$0xf]  ;;  %v52_v6 = vld [vmem:[%s941_s0 + $0x8] sm:$0xff]  ;;  %vm420_vm3 = vcmask 261120   ;;  %vm605_vm4 = vcmask 31744  }
   0x2   :  { %v68_v2 = vld [vmem:[%s940_s2] sm:$0xf]  ;;  %v77_v4 = vsel %vm75_vm0, %v70_v1, 0  ;;  %660 = vmatprep.mubr.msk.bf16.mxu1 %vm737_vm1, %v736_v0  ;;  %654 = vmatprep.mubr.msk.bf16.mxu0 %vm737_vm1, %v736_v0  ;;  %v54_v9 = vadd.f32 1e-12, %v52_v6  ;;  %v60_v10 = vsub.f32 1.0, %v52_v6 }
   0x3   :  { %v51_v3 = vld [vmem:[%s941_s0] sm:$0xff]  ;;  %v124_v5 = vsel %vm75_vm0, %v68_v2, 0  ;;  %653 = vmatpush3.bf16.msra.mxu0 %v77_v4  ;;  %v851_v15 = vld [vmem:[%s942_s1 + $0x8] sm:$0xff] }
   0x4   :  { %v53_v7 = vadd.f32 1e-12, %v51_v3  ;;  %v59_v8 = vsub.f32 1.0, %v51_v3  ;;  %659 = vmatpush3.bf16.msra.mxu1 %v124_v5  ;;  %v67_v11 = vpack.c.bf16 %v52_v6, %v51_v3  ;;  %v841_v12 = vld [vmem:[%s942_s1] sm:$0xff]  ;;  %664 = vmatprep.subr.bf16.mxu0 %v736_v0  ;;  %v62_v16 = vadd.f32 1e-12, %v60_v10 }
   0x5   :  { %670 = vmatprep.subr.bf16.mxu1 %v736_v0  ;;  %v237_v14 = vld [vmem:[%s943_s6] sm:$0xf]  ;;  %v220_v18 = vadd.f32 1e-12, %v841_v12  ;;  %v221_v19 = vadd.f32 1e-12, %v851_v15  ;;  %v234_v50 = vpack.c.bf16 %v851_v15, %v841_v12 }
   0x6   :  { %v61_v13 = vadd.f32 1e-12, %v59_v8  ;;  %720 = vlog2.f32 %v53_v7  ;;  %v242_v17 = vsel %vm75_vm0, %v237_v14, 0  ;;  %v226_v20 = vsub.f32 1.0, %v841_v12  ;;  %v168_v27 = vld [vmem:[%s944_s4] sm:$0xf] }
   0x7   :  { %722 = vlog2.f32 %v54_v9  ;;  %661 = vmatmul.mubr.msk.bf16.vlgmr.msra.gmra.mrb[0].mxu1 %vm71_vm2, %v67_v11  ;;  %v227_v21 = vsub.f32 1.0, %v851_v15  ;;  %v173_v33 = vsel %vm75_vm0, %v168_v27, 0  ;;  %v333_v36 = vld [vmem:[%s945_s7] sm:$0xf]  ;;  %v715_v52 = vld [vmem:[%s947_s9 + $0x8] sm:$0xff]  }
   0x8   :  { %724 = vlog2.f32 %v61_v13  ;;  %671 = vmatpush3.bf16.msra.mxu1 %v242_v17  ;;  %672 = vmatprep.mubr.msk.bf16.mxu1 %vm737_vm1, %v736_v0  ;;  %v228_v22 = vadd.f32 1e-12, %v226_v20  ;;  %v338_v43 = vsel %vm75_vm0, %v333_v36, 0  ;;  %v235_v44 = vld [vmem:[%s946_s5] sm:$0xf] }
   0x9   :  { %726 = vlog2.f32 %v62_v16  ;;  %682 = vmatprep.subr.bf16.mxu1 %v736_v0  ;;  %v229_v23 = vadd.f32 1e-12, %v227_v21  ;;  %v289_v48 = vsel %vm75_vm0, %v235_v44, 0  ;;  %v714_v51 = vld [vmem:[%s947_s9] sm:$0xff]  }
   0xa   :  { %728 = vlog2.f32 %v220_v18  ;;  %v618_v21 = vld [vmem:[%s948_s8] ss:$0 sm:$0xff] }
   0xb   :  { %730 = vlog2.f32 %v221_v19  ;;  %v623_v44 = vld [vmem:[%s952_s12] ss:$0 sm:$0xff] }
   0xc   :  { %732 = vlog2.f32 %v228_v22 }
   0xd   :  { %734 = vlog2.f32 %v229_v23 }
  0x10   :  { %v721_v24 = vpop.eup %720 }
  0x11   :  { %v723_v25 = vpop.eup %722  ;;  %v56_v26 = vmul.f32 0.6931472, %v721_v24 }
  0x12   :  { %v725_v28 = vpop.eup %724  ;;  %v58_v29 = vmul.f32 0.6931472, %v723_v25 }
  0x13   :  { %v727_v30 = vpop.eup %726  ;;  %v64_v38 = vmul.f32 0.6931472, %v725_v28 }
  0x14   :  { %v729_v31 = vpop.eup %728  ;;  %v69_v32 = vpack.c.bf16 %v58_v29, %v56_v26  ;;  %v66_v39 = vmul.f32 0.6931472, %v727_v30  ;;  %v716_v30 = vld [vmem:[%s949_s11] sm:$0xff]  }
  0x15   :  { %v731_v34 = vpop.eup %730  ;;  %v223_v35 = vmul.f32 0.6931472, %v729_v31  ;;  %v717_v31 = vld [vmem:[%s949_s11 + $0x8] sm:$0xff]  }
  0x16   :  { %655 = vmatmul.mubr.msk.bf16.vlgmr.msra.gmra.mrb[0].mxu0 %vm71_vm2, %v69_v32  ;;  %v225_v37 = vmul.f32 0.6931472, %v731_v34  ;;  %v733_v40 = vpop.eup %732  ;;  %v167_v45 = vpack.c.bf16 %v66_v39, %v64_v38  ;;  %v619_v32 = vld [vmem:[%s950_s10] ss:$0 sm:$0xff] }
  0x17   :  { %665 = vmatpush3.bf16.msra.mxu0 %v173_v33  ;;  %666 = vmatprep.mubr.msk.bf16.mxu0 %vm737_vm1, %v736_v0  ;;  %v735_v41 = vpop.eup %734  ;;  %v231_v46 = vmul.f32 0.6931472, %v733_v40 }
  0x18   :  { %v236_v42 = vpack.c.bf16 %v225_v37, %v223_v35  ;;  %676 = vmatprep.subr.bf16.mxu0 %v736_v0  ;;  %v233_v47 = vmul.f32 0.6931472, %v735_v41 }
  0x1a   :  { %673 = vmatmul.mubr.msk.bf16.vlgmr.msra.gmra.mrb[4].mxu1 %vm71_vm2, %v236_v42  ;;  %v332_v49 = vpack.c.bf16 %v233_v47, %v231_v46  ;;  %v718_v42 = vld [vmem:[%s951_s13] sm:$0xff]  }
  0x1b   :  { %683 = vmatpush3.bf16.msra.mxu1 %v338_v43  ;;  %684 = vmatprep.mubr.msk.bf16.mxu1 %vm737_vm1, %v736_v0  ;;  %v719_v43 = vld [vmem:[%s951_s13 + $0x8] sm:$0xff]  }
  0x1c   :  { %696 = vmatprep.subr.bf16.mxu1 %v736_v0 }
  0x1e   :  { %667 = vmatmul.mubr.msk.bf16.vlgmr.msra.gmra.mrb[4].mxu0 %vm71_vm2, %v167_v45 }
  0x1f   :  { %677 = vmatpush3.bf16.msra.mxu0 %v289_v48  ;;  %678 = vmatprep.mubr.msk.bf16.mxu0 %vm737_vm1, %v736_v0 }
  0x20   :  { %688 = vmatprep.subr.bf16.mxu0 %v736_v0 }
  0x22   :  { %685 = vmatmul.mubr.msk.bf16.vlgmr.msra.gmra.mrb[8].mxu1 %vm71_vm2, %v332_v49 }
  0x23   :  { %700 = vmatprep.mubr.msk.bf16.mxu1 %vm737_vm1, %v736_v0  ;;  %697 = vmatpush3.bf16.msra.mxu1 %v716_v30 }
  0x24   :  { %698 = vmatprep.subr.bf16.mxu1 %v736_v0 }
  0x26   :  { %679 = vmatmul.mubr.msk.bf16.vlgmr.msra.gmra.mrb[8].mxu0 %vm71_vm2, %v234_v50 }
  0x27   :  { %692 = vmatprep.mubr.msk.bf16.mxu0 %vm737_vm1, %v736_v0  ;;  %689 = vmatpush3.bf16.msra.mxu0 %v714_v51 }
  0x28   :  { %690 = vmatprep.subr.bf16.mxu0 %v736_v0  ;;  %699 = vmatpush3.bf16.msra.mxu1 %v717_v31 }
  0x2b   :  { %691 = vmatpush3.bf16.msra.mxu0 %v715_v52 }
  0x2c   :  { %704 = vmatprep.subr.bf16.mxu0 %v736_v0 }
  0xda   :  { %v160_v53 = vpop.f32.mrb[0].mxu1 }
  0xdb   :  { %v662_v54 = vpop.f32.mrb[1].mxu1 }
  0xdc   :  { %v163_v55 = vpop.f32.mrb[2].mxu1 }
  0xdd   :  { %v663_v56 = vpop.f32.mrb[3].mxu1 }
  0xe9   :  { %v113_v57 = vpop.f32.mrb[0].mxu0 }
  0xea   :  { %v161_v58 = vadd.f32 %v160_v53, %v113_v57  ;;  %v656_v59 = vpop.f32.mrb[1].mxu0 }
  0xeb   :  { %v116_v60 = vpop.f32.mrb[2].mxu0 }
  0xec   :  { %v164_v61 = vadd.f32 %v163_v55, %v116_v60  ;;  %v657_v62 = vpop.f32.mrb[3].mxu0 }
  0xed   :  { %v278_v63 = vpop.f32.mrb[4].mxu1 }
  0xee   :  { %v674_v1 = vpop.f32.mrb[5].mxu1 }
  0xef   :  { %v281_v2 = vpop.f32.mrb[6].mxu1 }
  0xf0   :  { %v675_v3 = vpop.f32.mrb[7].mxu1 }
  0xf1   :  { %v209_v4 = vpop.f32.mrb[4].mxu0 }
  0xf2   :  { %v216_v5 = vadd.f32 %v209_v4, %v161_v58  ;;  %v668_v6 = vpop.f32.mrb[5].mxu0 }
  0xf3   :  { %v212_v7 = vpop.f32.mrb[6].mxu0 }
  0xf4   :  { %v217_v8 = vadd.f32 %v212_v7, %v164_v61  ;;  %v669_v9 = vpop.f32.mrb[7].mxu0 }
  0xf5   :  { %v374_v10 = vpop.f32.mrb[8].mxu1 }
  0xf6   :  { %v686_v11 = vpop.f32.mrb[9].mxu1 }
  0xf7   :  { %v377_v12 = vpop.f32.mrb[10].mxu1 }
  0xf8   :  { %v687_v13 = vpop.f32.mrb[11].mxu1 }
  0xf9   :  { %v325_v14 = vpop.f32.mrb[8].mxu0 }
  0xfa   :  { %v326_v15 = vadd.f32 %v325_v14, %v278_v63  ;;  %v680_v16 = vpop.f32.mrb[9].mxu0 }
  0xfb   :  { %v328_v17 = vpop.f32.mrb[10].mxu0 }
  0xfc   :  { %v381_v18 = vadd.f32 %v374_v10, %v326_v15  ;;  %v329_v19 = vadd.f32 %v328_v17, %v281_v2  ;;  %v681_v20 = vpop.f32.mrb[11].mxu0 }
  0xfe   :  { %v383_v22 = vadd.f32 %v381_v18, %v216_v5  ;;  %v382_v23 = vadd.f32 %v377_v12, %v329_v19 }
 0x100   :  { %v392_v24 = vadd.f32 %v618_v21, %v383_v22  ;;  %v384_v25 = vadd.f32 %v382_v23, %v217_v8 }
 0x102   :  { %v393_v26 = vadd.f32 %v618_v21, %v384_v25  ;;  %v394_v27 = vmax.f32 %v392_v24, 0.0 }
 0x104   :  { %v395_v28 = vmax.f32 %v393_v26, 0.0 }
 0x106   :  { %v396_v29 = vpack.c.bf16 %v395_v28, %v394_v27 }
 0x108   :  { %693 = vmatmul.mubr.msk.bf16.vlgmr.msra.gmra.mrb[12].mxu0 %vm420_vm3, %v396_v29 }
 0x109   :  { %708 = vmatprep.mubr.msk.bf16.mxu0 %vm737_vm1, %v736_v0  ;;  %705 = vmatpush3.bf16.msra.mxu0 %v718_v42 }
 0x10a   :  { %706 = vmatprep.subr.bf16.mxu0 %v736_v0  ;;  %v627_v0 = vld [vmem:[%s953_s14] ss:$0 sm:$0xff] }
 0x10d   :  { %707 = vmatpush3.bf16.msra.mxu0 %v719_v43 }
 0x1db   :  { %v458_v33 = vpop.f32.mrb[12].mxu0 }
 0x1dc   :  { %v459_v34 = vadd.f32 %v619_v32, %v458_v33  ;;  %v694_v35 = vpop.f32.mrb[13].mxu0 }
 0x1dd   :  { %v461_v36 = vpop.f32.mrb[14].mxu0 }
 0x1de   :  { %v462_v37 = vadd.f32 %v619_v32, %v461_v36  ;;  %v695_v38 = vpop.f32.mrb[15].mxu0  ;;  %v465_v39 = vmax.f32 %v459_v34, 0.0 }
 0x1e0   :  { %v466_v40 = vmax.f32 %v462_v37, 0.0 }
 0x1e2   :  { %v467_v41 = vpack.c.bf16 %v466_v40, %v465_v39 }
 0x1e4   :  { %701 = vmatmul.mubr.msk.bf16.vlgmr.msra.gmra.mrb[12].mxu1 %vm420_vm3, %v467_v41 }
 0x2b7   :  { %v528_v45 = vpop.f32.mrb[12].mxu1 }
 0x2b8   :  { %v529_v46 = vadd.f32 %v623_v44, %v528_v45  ;;  %v702_v47 = vpop.f32.mrb[13].mxu1 }
 0x2b9   :  { %v531_v48 = vpop.f32.mrb[14].mxu1 }
 0x2ba   :  { %v532_v49 = vadd.f32 %v623_v44, %v531_v48  ;;  %v703_v50 = vpop.f32.mrb[15].mxu1  ;;  %v535_v51 = vmax.f32 %v529_v46, 0.0 }
 0x2bc   :  { %v536_v52 = vmax.f32 %v532_v49, 0.0 }
 0x2be   :  { %v537_v53 = vpack.c.bf16 %v536_v52, %v535_v51 }
 0x2c0   :  { %709 = vmatmul.mubr.msk.bf16.vlgmr.msra.gmra.mrb[16].mxu0 %vm420_vm3, %v537_v53 }
 0x393   :  { %v598_v54 = vpop.f32.mrb[16].mxu0 }
 0x394   :  { %v599_v55 = vadd.f32 %v627_v0, %v598_v54  ;;  %v710_v56 = vpop.f32.mrb[17].mxu0 }
 0x395   :  { %v601_v57 = vpop.f32.mrb[18].mxu0 }
 0x396   :  { %606 = vst.msk [vmem:[%s954_s15] sm:$0xff] %vm605_vm4, %v599_v55  ;;  %v602_v58 = vadd.f32 %v627_v0, %v601_v57  ;;  %v711_v59 = vpop.f32.mrb[19].mxu0 }
 0x398   :  { %607 = vst.msk [vmem:[%s954_s15 + $0x8] sm:$0xff] %vm605_vm4, %v602_v58 }

</bundles_post_ra>
